<compile_context>
chip_gen: v5e
topology: v5e:2x2
jax: 0.10.0
libtpu: 0.0.40
codegen_flags: <defaults>
</compile_context>

<pallas_src>
import jax
import jax.numpy as jnp
from jax.experimental import pallas as pl
from jax.experimental.pallas import tpu as pltpu


_LANES = 128
_SAMPLES_PER_ROW = _LANES // 2  # 2 f32 features per sample -> 64 samples per 128-lane row


def _round_up(a: int, m: int) -> int:
    return ((a + m - 1) // m) * m


def _cdiv(a: int, b: int) -> int:
    return -(-a // b)


def xor_kernel(x_ref, w1_ref, b1_ref, w2_ref, b2_ref, o_ref):
    """One (TR, 128) batch tile.

    x_ref / o_ref : (TR, 128) f32 VMEM tiles holding the natural row-major (B, 2)
                    data, i.e. lanes alternate [x0, x1, x0, x1, ...] (64 samples
                    per 128-lane row; no sample straddles a row boundary).
    w1_ref, w2_ref: (2, 2) f32 in SMEM, PyTorch nn.Linear (out, in) layout.
    b1_ref, b2_ref: (2,)  f32 in SMEM.
    """
    a = x_ref[...]                                       # (TR, 128), full slab

    lane = jax.lax.broadcasted_iota(jnp.int32, a.shape, 1)
    even = (lane % 2) == 0                               # feature-0 lane positions

    # Pair exchange on the XLU (its own VLIW slot, essentially free).
    # pltpu.roll follows np.roll semantics: out[i] = in[(i - shift) % 128].
    nxt = pltpu.roll(a, 127, 1)                          # out[i] = a[i + 1]  (127 == -1 mod 128)
    prv = pltpu.roll(a, 1, 1)                            # out[i] = a[i - 1]

    # Per-sample features, replicated onto both of the sample's lanes so all
    # arithmetic below runs on full (8,128)-aligned slabs.
    x0 = jnp.where(even, a, prv)
    x1 = jnp.where(even, nxt, a)

    # fc1 + ReLU, then fc4: 2-wide contractions expanded as scalar*vector FMAs
    # on the VPU (deliberately no MXU — a (., 2) x (2, 2) matmul would waste it).
    h0 = jnp.maximum(x0 * w1_ref[0, 0] + x1 * w1_ref[0, 1] + b1_ref[0], 0.0)
    h1 = jnp.maximum(x0 * w1_ref[1, 0] + x1 * w1_ref[1, 1] + b1_ref[1], 0.0)
    y0 = h0 * w2_ref[0, 0] + h1 * w2_ref[0, 1] + b2_ref[0]
    y1 = h0 * w2_ref[1, 0] + h1 * w2_ref[1, 1] + b2_ref[1]

    # 2-class log_softmax, overflow-safe closed form:
    #   o0 = -softplus(-(y0 - y1)) = -(max(-d, 0) + log(1 + exp(-|d|)))
    #   o1 = o0 - d
    # One exp + one log per lane instead of 2x exp + 1x log -> lower EUP pressure.
    d = y0 - y1
    o0 = -(jnp.maximum(-d, 0.0) + jnp.log(1.0 + jnp.exp(-jnp.abs(d))))
    o1 = o0 - d

    # Interleave back into the natural (B, 2) order: full-width unmasked store.
    o_ref[...] = jnp.where(even, o0, o1)


def xor_forward(x, w1, b1, w2, b2, *, tile_rows=256):
    """Forward pass of the XOR module.

    x      : (B, 2) f32
    w1, w2 : (2, 2) f32, PyTorch nn.Linear (out, in) layout
    b1, b2 : (2,)  f32
    returns: (B, 2) f32 log-probabilities
    """
    B = x.shape[0]

    rows_needed = max(1, _cdiv(B, _SAMPLES_PER_ROW))
    # Tile rows: multiple of 8 sublanes, capped at `tile_rows` (the main tuning
    # knob).  When there is enough work, aim for >= 2 grid tiles so both v7x
    # TensorCores get a batch shard via the "parallel" grid axis.
    if rows_needed >= 16:
        cand = _round_up(_cdiv(rows_needed, 2), 8)
    else:
        cand = _round_up(rows_needed, 8)
    tr = max(8, min(_round_up(tile_rows, 8), cand))
    n_tiles = _cdiv(rows_needed, tr)
    rows_pad = n_tiles * tr
    b_pad = rows_pad * _SAMPLES_PER_ROW

    if b_pad != B:
        # Zero padding only on the ragged tail; padded lanes compute finite
        # garbage that is stripped below.
        x = jnp.pad(x, ((0, b_pad - B), (0, 0)))
    # Free, layout-preserving view: (b_pad, 2) -> (rows_pad, 128).  Features stay
    # interleaved along lanes; the kernel de-interleaves in VMEM (no extra HBM pass).
    x2d = x.reshape(rows_pad, _LANES)

    smem = pl.BlockSpec(memory_space=pltpu.MemorySpace.SMEM)
    out2d = pl.pallas_call(
        xor_kernel,
        out_shape=jax.ShapeDtypeStruct((rows_pad, _LANES), jnp.float32),
        grid=(n_tiles,),
        in_specs=[
            pl.BlockSpec((tr, _LANES), lambda i: (i, 0)),  # batch tile
            smem,  # w1 (resident across the whole grid)
            smem,  # b1
            smem,  # w2
            smem,  # b2
        ],
        out_specs=pl.BlockSpec((tr, _LANES), lambda i: (i, 0)),
        compiler_params=pltpu.CompilerParams(
            dimension_semantics=("parallel",),
        ),
    )(x2d, w1, b1, w2, b2)

    # Free view back to (B, 2).
    return out2d.reshape(b_pad, 2)[:B]


def _reference(x, w1, b1, w2, b2):
    h = jnp.maximum(x @ w1.T + b1, 0.0)
    y = h @ w2.T + b2
    return jax.nn.log_softmax(y, axis=-1)


if __name__ == "__main__":
    key = jax.random.PRNGKey(0)
    kx, k1, k2, k3, k4 = jax.random.split(key, 5)

    # Small batch consistent with the module's (B, 2) input.
    B = 256
    x = jax.random.normal(kx, (B, 2), dtype=jnp.float32)

    # PyTorch Linear layout: weight (out, in), bias (out,)
    w1 = jax.random.normal(k1, (2, 2), dtype=jnp.float32) * 0.5
    b1 = jax.random.normal(k2, (2,), dtype=jnp.float32) * 0.1
    w2 = jax.random.normal(k3, (2, 2), dtype=jnp.float32) * 0.5
    b2 = jax.random.normal(k4, (2,), dtype=jnp.float32) * 0.1

    out = jax.block_until_ready(xor_forward(x, w1, b1, w2, b2))
    ref = _reference(x, w1, b1, w2, b2)
    assert out.shape == (B, 2)
    assert jnp.allclose(out, ref, atol=1e-5, rtol=1e-5), "mismatch vs reference"

    # Ragged, non-multiple-of-64 batch (padding path).
    xs = x[:7]
    outs = jax.block_until_ready(xor_forward(xs, w1, b1, w2, b2))
    assert jnp.allclose(outs, _reference(xs, w1, b1, w2, b2), atol=1e-5, rtol=1e-5)

    # Multi-tile path: enough rows that the wrapper emits >= 2 grid tiles
    # (exercises the "parallel" batch axis / v7x megacore split).
    xl = jax.random.normal(kx, (2048, 2), dtype=jnp.float32)
    outl = jax.block_until_ready(xor_forward(xl, w1, b1, w2, b2))
    assert jnp.allclose(outl, _reference(xl, w1, b1, w2, b2), atol=1e-5, rtol=1e-5)

    print("KERNEL_OK")
</pallas_src>

<mosaic_0001>
module attributes {stable_mosaic.version = 11 : i64} {
  func.func @xor_kernel(%arg0: i32, %arg1: memref<8x128xf32, #tpu.memory_space<vmem>>, %arg2: memref<2x2xf32, #tpu.memory_space<smem>>, %arg3: memref<2xf32, #tpu.memory_space<smem>>, %arg4: memref<2x2xf32, #tpu.memory_space<smem>>, %arg5: memref<2xf32, #tpu.memory_space<smem>>, %arg6: memref<8x128xf32, #tpu.memory_space<vmem>>) attributes {dimension_semantics = [#tpu.dimension_semantics<parallel>], iteration_bounds = array<i64: 1>, scalar_prefetch = 0 : i64, scratch_operands = 0 : i64, tpu.core_type = #tpu.core_type<tc>, window_params = [{transform_indices = @transform_0, window_bounds = array<i64: 8, 128>}, {transform_indices = @transform_1, window_bounds = array<i64: 2, 2>}, {transform_indices = @transform_2, window_bounds = array<i64: 2>}, {transform_indices = @transform_3, window_bounds = array<i64: 2, 2>}, {transform_indices = @transform_4, window_bounds = array<i64: 2>}, {transform_indices = @transform_5, window_bounds = array<i64: 8, 128>}]} {
    %c0 = arith.constant 0 : index
    %c0_0 = arith.constant 0 : index
    %0 = vector.load %arg1[%c0, %c0_0] : memref<8x128xf32, #tpu.memory_space<vmem>>, vector<8x128xf32>
    %1 = tpu.iota {dimensions = array<i32: 1>} : vector<8x128xi32>
    %c2_i32 = arith.constant 2 : i32
    %c0_i32 = arith.constant 0 : i32
    %2 = arith.cmpi eq, %c2_i32, %c0_i32 : i32
    %c1_i32 = arith.constant 1 : i32
    %3 = arith.select %2, %c1_i32, %c2_i32 : i32
    %4 = vector.broadcast %3 : i32 to vector<8x128xi32>
    %5 = arith.remsi %1, %4 : vector<8x128xi32>
    %c0_i32_1 = arith.constant 0 : i32
    %6 = vector.broadcast %c0_i32_1 : i32 to vector<8x128xi32>
    %7 = arith.cmpi ne, %5, %6 : vector<8x128xi32>
    %c0_i32_2 = arith.constant 0 : i32
    %8 = vector.broadcast %c0_i32_2 : i32 to vector<8x128xi32>
    %9 = arith.cmpi slt, %5, %8 : vector<8x128xi32>
    %c0_i32_3 = arith.constant 0 : i32
    %10 = arith.cmpi slt, %3, %c0_i32_3 : i32
    %11 = vector.broadcast %10 : i1 to vector<8x128xi1>
    %12 = vector.broadcast %11 : vector<8x128xi1> to vector<8x128xi1>
    %13 = arith.xori %9, %12 : vector<8x128xi1>
    %14 = arith.andi %13, %7 : vector<8x128xi1>
    %15 = vector.broadcast %3 : i32 to vector<8x128xi32>
    %16 = arith.addi %5, %15 : vector<8x128xi32>
    %17 = arith.select %14, %16, %5 : vector<8x128xi1>, vector<8x128xi32>
    %c0_i32_4 = arith.constant 0 : i32
    %18 = vector.broadcast %c0_i32_4 : i32 to vector<8x128xi32>
    %19 = arith.cmpi eq, %17, %18 : vector<8x128xi32>
    %c127_i32 = arith.constant 127 : i32
    %20 = tpu.dynamic_rotate %0 by %c127_i32 dim 1 : vector<8x128xf32>, i32 -> vector<8x128xf32>
    %c1_i32_5 = arith.constant 1 : i32
    %21 = tpu.dynamic_rotate %0 by %c1_i32_5 dim 1 : vector<8x128xf32>, i32 -> vector<8x128xf32>
    %22 = arith.select %19, %0, %21 : vector<8x128xi1>, vector<8x128xf32>
    %23 = arith.select %19, %20, %0 : vector<8x128xi1>, vector<8x128xf32>
    %c0_6 = arith.constant 0 : index
    %c0_7 = arith.constant 0 : index
    %24 = memref.load %arg2[%c0_6, %c0_7] : memref<2x2xf32, #tpu.memory_space<smem>>
    %25 = vector.broadcast %24 : f32 to vector<8x128xf32>
    %26 = arith.mulf %22, %25 : vector<8x128xf32>
    %c0_8 = arith.constant 0 : index
    %c1 = arith.constant 1 : index
    %27 = memref.load %arg2[%c0_8, %c1] : memref<2x2xf32, #tpu.memory_space<smem>>
    %28 = vector.broadcast %27 : f32 to vector<8x128xf32>
    %29 = arith.mulf %23, %28 : vector<8x128xf32>
    %30 = arith.addf %26, %29 : vector<8x128xf32>
    %c0_9 = arith.constant 0 : index
    %31 = memref.load %arg3[%c0_9] : memref<2xf32, #tpu.memory_space<smem>>
    %32 = vector.broadcast %31 : f32 to vector<8x128xf32>
    %33 = arith.addf %30, %32 : vector<8x128xf32>
    %cst = arith.constant 0.000000e+00 : f32
    %34 = vector.broadcast %cst : f32 to vector<8x128xf32>
    %35 = arith.maximumf %33, %34 : vector<8x128xf32>
    %c1_10 = arith.constant 1 : index
    %c0_11 = arith.constant 0 : index
    %36 = memref.load %arg2[%c1_10, %c0_11] : memref<2x2xf32, #tpu.memory_space<smem>>
    %37 = vector.broadcast %36 : f32 to vector<8x128xf32>
    %38 = arith.mulf %22, %37 : vector<8x128xf32>
    %c1_12 = arith.constant 1 : index
    %c1_13 = arith.constant 1 : index
    %39 = memref.load %arg2[%c1_12, %c1_13] : memref<2x2xf32, #tpu.memory_space<smem>>
    %40 = vector.broadcast %39 : f32 to vector<8x128xf32>
    %41 = arith.mulf %23, %40 : vector<8x128xf32>
    %42 = arith.addf %38, %41 : vector<8x128xf32>
    %c1_14 = arith.constant 1 : index
    %43 = memref.load %arg3[%c1_14] : memref<2xf32, #tpu.memory_space<smem>>
    %44 = vector.broadcast %43 : f32 to vector<8x128xf32>
    %45 = arith.addf %42, %44 : vector<8x128xf32>
    %cst_15 = arith.constant 0.000000e+00 : f32
    %46 = vector.broadcast %cst_15 : f32 to vector<8x128xf32>
    %47 = arith.maximumf %45, %46 : vector<8x128xf32>
    %c0_16 = arith.constant 0 : index
    %c0_17 = arith.constant 0 : index
    %48 = memref.load %arg4[%c0_16, %c0_17] : memref<2x2xf32, #tpu.memory_space<smem>>
    %49 = vector.broadcast %48 : f32 to vector<8x128xf32>
    %50 = arith.mulf %35, %49 : vector<8x128xf32>
    %c0_18 = arith.constant 0 : index
    %c1_19 = arith.constant 1 : index
    %51 = memref.load %arg4[%c0_18, %c1_19] : memref<2x2xf32, #tpu.memory_space<smem>>
    %52 = vector.broadcast %51 : f32 to vector<8x128xf32>
    %53 = arith.mulf %47, %52 : vector<8x128xf32>
    %54 = arith.addf %50, %53 : vector<8x128xf32>
    %c0_20 = arith.constant 0 : index
    %55 = memref.load %arg5[%c0_20] : memref<2xf32, #tpu.memory_space<smem>>
    %56 = vector.broadcast %55 : f32 to vector<8x128xf32>
    %57 = arith.addf %54, %56 : vector<8x128xf32>
    %c1_21 = arith.constant 1 : index
    %c0_22 = arith.constant 0 : index
    %58 = memref.load %arg4[%c1_21, %c0_22] : memref<2x2xf32, #tpu.memory_space<smem>>
    %59 = vector.broadcast %58 : f32 to vector<8x128xf32>
    %60 = arith.mulf %35, %59 : vector<8x128xf32>
    %c1_23 = arith.constant 1 : index
    %c1_24 = arith.constant 1 : index
    %61 = memref.load %arg4[%c1_23, %c1_24] : memref<2x2xf32, #tpu.memory_space<smem>>
    %62 = vector.broadcast %61 : f32 to vector<8x128xf32>
    %63 = arith.mulf %47, %62 : vector<8x128xf32>
    %64 = arith.addf %60, %63 : vector<8x128xf32>
    %c1_25 = arith.constant 1 : index
    %65 = memref.load %arg5[%c1_25] : memref<2xf32, #tpu.memory_space<smem>>
    %66 = vector.broadcast %65 : f32 to vector<8x128xf32>
    %67 = arith.addf %64, %66 : vector<8x128xf32>
    %68 = arith.subf %57, %67 : vector<8x128xf32>
    %cst_26 = arith.constant 0.000000e+00 : f32
    %69 = vector.broadcast %cst_26 : f32 to vector<8x128xf32>
    %70 = arith.subf %69, %68 : vector<8x128xf32>
    %cst_27 = arith.constant 0.000000e+00 : f32
    %71 = vector.broadcast %cst_27 : f32 to vector<8x128xf32>
    %72 = arith.maximumf %70, %71 : vector<8x128xf32>
    %73 = math.absf %68 : vector<8x128xf32>
    %cst_28 = arith.constant 0.000000e+00 : f32
    %74 = vector.broadcast %cst_28 : f32 to vector<8x128xf32>
    %75 = arith.subf %74, %73 : vector<8x128xf32>
    %76 = math.exp %75 : vector<8x128xf32>
    %cst_29 = arith.constant 1.000000e+00 : f32
    %77 = vector.broadcast %cst_29 : f32 to vector<8x128xf32>
    %78 = arith.addf %77, %76 : vector<8x128xf32>
    %79 = math.log %78 : vector<8x128xf32>
    %80 = arith.addf %72, %79 : vector<8x128xf32>
    %cst_30 = arith.constant 0.000000e+00 : f32
    %81 = vector.broadcast %cst_30 : f32 to vector<8x128xf32>
    %82 = arith.subf %81, %80 : vector<8x128xf32>
    %83 = arith.subf %82, %68 : vector<8x128xf32>
    %84 = arith.select %19, %82, %83 : vector<8x128xi1>, vector<8x128xf32>
    %c0_31 = arith.constant 0 : index
    %c0_32 = arith.constant 0 : index
    %85 = vector.load %arg6[%c0_31, %c0_32] : memref<8x128xf32, #tpu.memory_space<vmem>>, vector<8x128xf32>
    tpu.vector_store %arg6[%c0_31, %c0_32], %84 {strides = array<i32>} : memref<8x128xf32, #tpu.memory_space<vmem>>, vector<8x128xf32>,
    return
  }
  func.func @transform_0(%arg0: i32) -> (i32, i32) {
    %c0_i32 = arith.constant 0 : i32
    %c0_i32_0 = arith.constant 0 : i32
    return %arg0, %c0_i32 : i32, i32
  }
  func.func @transform_1(%arg0: i32) -> (i32, i32) {
    %c0_i32 = arith.constant 0 : i32
    %c0_i32_0 = arith.constant 0 : i32
    %c0_i32_1 = arith.constant 0 : i32
    return %c0_i32, %c0_i32_0 : i32, i32
  }
  func.func @transform_2(%arg0: i32) -> i32 {
    %c0_i32 = arith.constant 0 : i32
    %c0_i32_0 = arith.constant 0 : i32
    return %c0_i32 : i32
  }
  func.func @transform_3(%arg0: i32) -> (i32, i32) {
    %c0_i32 = arith.constant 0 : i32
    %c0_i32_0 = arith.constant 0 : i32
    %c0_i32_1 = arith.constant 0 : i32
    return %c0_i32, %c0_i32_0 : i32, i32
  }
  func.func @transform_4(%arg0: i32) -> i32 {
    %c0_i32 = arith.constant 0 : i32
    %c0_i32_0 = arith.constant 0 : i32
    return %c0_i32 : i32
  }
  func.func @transform_5(%arg0: i32) -> (i32, i32) {
    %c0_i32 = arith.constant 0 : i32
    %c0_i32_0 = arith.constant 0 : i32
    return %arg0, %c0_i32 : i32, i32
  }
}

</mosaic_0001>

<bundles_post_ra>
// kernel: tpu_custom_call.1
= control target key start
LH: loop header
LB: loop body
LE: loop exit
PB: predicated region body
PF: predicated region fallthrough
CT: control target
= control target key end

     0   :  { %10 = vsyncpa [#allocation3], 0  ;;  %s378_s0 = inlined_call_operand.hbm [shape: f32[8,128], index: 0, kind: input, shape index: {}]   ;;  %s379_s1 = inlined_call_operand.hbm [shape: f32[2,2], index: 1, kind: input, shape index: {}]   ;;  %s380_s2 = inlined_call_operand.hbm [shape: f32[2], index: 2, kind: input, shape index: {}]   ;;  %s381_s3 = inlined_call_operand.vmem [shape: f32[2,2], index: 3, kind: input, shape index: {}]   ;;  %s382_s4 = inlined_call_operand.vmem [shape: f32[2], index: 4, kind: input, shape index: {}]   ;;  %s383_s5 = inlined_call_operand.hbm [shape: f32[8,128], index: 5, kind: output, shape index: {}]  }
   0x1   :  { %11 = vsyncpa [#allocation5], 0 }
   0x2   :  { %12 = vsyncpa [#allocation9], 0 }
   0x3   :  { %13 = vsyncpa [#allocation6], 0 }
   0x4   :  { %14 = vsyncpa [#allocation12], 0 }
   0x5   :  { %15 = vsyncpa [#allocation4], 0  ;;  %s21_s20 = sshll.u32 %s378_s0, 4  ;;  %s312_s21 = smov [#allocation2]   ;;  %s22_s20 = int_to_ptr.hbm [resolvable:$true] %s21_s20 }
   0x6   :  { %s23_s22 = sshll.u32 %s312_s21, 4  ;;  %s32_s25 = sshll.u32 %s379_s1, 4  ;;  %s24_s22 = int_to_ptr.vmem [resolvable:$true] %s23_s22  ;;  %s33_s25 = int_to_ptr.hbm [resolvable:$true] %s32_s25 }
   0x7   :  { %26 = dma.hbm_to_vmem [thread:$0]  %s22_s20, 128, %s24_s22, [#allocation3]  }
   0x8   :  { %s313_s26 = smov [#allocation7]   ;;  %s41_s29 = sshll.u32 %s380_s2, 4  ;;  %s42_s29 = int_to_ptr.hbm [resolvable:$true] %s41_s29 }
   0x9   :  { %35 = dma.hbm_to_smem %s33_s25, 32, %s313_s26, [#allocation5]  }
   0xa   :  { %s50_s0 = sshll.u32 %s381_s3, 4  ;;  %s314_s7 = smov [#allocation8]   ;;  %s51_s0 = int_to_ptr.vmem [resolvable:$true] %s50_s0 }
   0xb   :  { %44 = dma.hbm_to_smem %s42_s29, 16, %s314_s7, [#allocation9]  }
   0xc   :  { %s315_s8 = smov [#allocation10]   ;;  %s59_s10 = sshll.u32 %s382_s4, 4  ;;  %s60_s10 = int_to_ptr.vmem [resolvable:$true] %s59_s10 }
   0xd   :  { %53 = dma.vmem_to_smem %s51_s0, 32, %s315_s8, [#allocation6]  }
   0xe   :  { %s316_s11 = smov [#allocation11]  }
   0xf   :  { %62 = dma.vmem_to_smem %s60_s10, 16, %s316_s11, [#allocation12]  }
  0x10   :  { %300 = dma.done.wait [#allocation3], 128  }
  0x11   :  { %301 = vsyncadd [#allocation3], 4294967168 }
  0x12   :  { %302 = dma.done.wait [#allocation5], 32  }
  0x13   :  { %303 = vsyncadd [#allocation5], 4294967264 }
  0x14   :  { %304 = dma.done.wait [#allocation9], 16  }
  0x15   :  { %305 = vsyncadd [#allocation9], 4294967280 }
  0x16   :  { %306 = dma.done.wait [#allocation6], 32  }
  0x17   :  { %307 = vsyncadd [#allocation6], 4294967264 }
  0x18   :  { %308 = dma.done.wait [#allocation12], 16  }
  0x19   :  { %309 = vsyncadd [#allocation12], 4294967280 }
  0x1a   :  { %83 = sfence }
  0x1b   :  { %v84_v0 = vld [vmem:[#allocation2] sm:$0xff]  ;;  %s317_s2 = smov 127   ;;  %s318_s3 = smov 1   ;;  %v85_v1 = vlaneseq }
  0x1c   :  { %100 = vrot.lane.b32.xlu0 %v84_v0, %s317_s2  ;;  %s184_s4 = sld [smem:[#allocation7 + $0x1]]  ;;  %s319_s23 = smov [#allocation13]  }
  0x1d   :  { %v86_v2 = vand.u32 127, %v85_v1  ;;  %s186_s12 = sld [smem:[#allocation7 + $0x81]]  ;;  %s168_s24 = sshll.u32 %s319_s23, 4  ;;  %s169_s24 = int_to_ptr.vmem [resolvable:$true] %s168_s24 }
  0x1e   :  { %s106_s13 = sld [smem:[#allocation7]]  ;;  %s170_s27 = sshll.u32 %s383_s5, 4  ;;  %s171_s27 = int_to_ptr.hbm [resolvable:$true] %s170_s27 }
  0x1f   :  { %s185_s14 = sld [smem:[#allocation7 + $0x80]]  ;;  %v91_v3 = vand.u32 1, %v86_v2 }
  0x20   :  { %s113_s15 = sld [smem:[#allocation8]] }
  0x21   :  { %s187_s16 = sld [smem:[#allocation8 + $0x1]]  ;;  %vm365_vm0 = vcmp.eq.s32.totalorder %v91_v3, 0 }
  0x22   :  { %s128_s17 = sld [smem:[#allocation10]]  ;;  %v110_v6 = vstv %s184_s4 }
  0x23   :  { %s188_s18 = sld [smem:[#allocation10 + $0x1]]  ;;  %v121_v7 = vstv %s186_s12 }
  0x24   :  { %102 = vrot.lane.b32.xlu0 %v84_v0, %s318_s3  ;;  %s189_s19 = sld [smem:[#allocation10 + $0x80]]  ;;  %v107_v9 = vstv %s106_s13 }
  0x25   :  { %v118_v10 = vstv %s185_s14  ;;  %s190_s20 = sld [smem:[#allocation10 + $0x81]] }
  0x26   :  { %s135_s21 = sld [smem:[#allocation11]]  ;;  %v114_v17 = vstv %s113_s15 }
  0x27   :  { %v125_v18 = vstv %s187_s16  ;;  %s191_s22 = sld [smem:[#allocation11 + $0x1]] }
  0x28   :  { %v129_v23 = vstv %s128_s17 }
  0x29   :  { %v132_v24 = vstv %s188_s18 }
  0x2a   :  { %v139_v25 = vstv %s189_s19 }
  0x2b   :  { %v142_v26 = vstv %s190_s20 }
  0x2c   :  { %v136_v33 = vstv %s135_s21 }
  0x2d   :  { %v146_v34 = vstv %s191_s22 }
  0x8e   :  { %v101_v4 = vpop.permute.xlu0 %100 }
  0x8f   :  { %v105_v8 = vsel %vm365_vm0, %v101_v4, %v84_v0 }
  0x90   :  { %v111_v13 = vmul.f32 %v110_v6, %v105_v8  ;;  %v122_v14 = vmul.f32 %v121_v7, %v105_v8 }
  0x96   :  { %v103_v11 = vpop.permute.xlu0 %102 }
  0x97   :  { %v104_v12 = vsel %vm365_vm0, %v84_v0, %v103_v11 }
  0x98   :  { %v108_v15 = vmul.f32 %v107_v9, %v104_v12  ;;  %v119_v16 = vmul.f32 %v118_v10, %v104_v12 }
  0x9a   :  { %v112_v19 = vadd.f32 %v111_v13, %v108_v15  ;;  %v123_v20 = vadd.f32 %v122_v14, %v119_v16 }
  0x9c   :  { %v115_v21 = vadd.f32 %v114_v17, %v112_v19  ;;  %v126_v22 = vadd.f32 %v125_v18, %v123_v20 }
  0x9e   :  { %v116_v27 = vmax.f32 %v115_v21, 0.0  ;;  %v127_v28 = vmax.f32 %v126_v22, 0.0 }
  0xa0   :  { %v130_v29 = vmul.f32 %v129_v23, %v116_v27  ;;  %v133_v30 = vmul.f32 %v132_v24, %v127_v28  ;;  %v140_v31 = vmul.f32 %v139_v25, %v116_v27  ;;  %v143_v32 = vmul.f32 %v142_v26, %v127_v28 }
  0xa2   :  { %v134_v35 = vadd.f32 %v133_v30, %v130_v29  ;;  %v144_v36 = vadd.f32 %v143_v32, %v140_v31 }
  0xa4   :  { %v137_v37 = vadd.f32 %v136_v33, %v134_v35  ;;  %v147_v38 = vadd.f32 %v146_v34, %v144_v36 }
  0xa6   :  { %v148_v39 = vsub.f32 %v137_v37, %v147_v38 }
  0xa8   :  { %v151_v40 = vand.u32 2147483647, %v148_v39  ;;  %v149_v45 = vsub.f32 0.0, %v148_v39 }
  0xaa   :  { %v152_v41 = vsub.f32 0.0, %v151_v40  ;;  %v150_v47 = vmax.f32 %v149_v45, 0.0 }
  0xac   :  { %v153_v42 = vmul.f32 1.442695, %v152_v41 }
  0xae   :  { %200 = vpow2.f32 %v153_v42 }
  0xb4   :  { %v201_v43 = vpop.eup %200 }
  0xb5   :  { %v155_v44 = vadd.f32 1.0, %v201_v43 }
  0xb7   :  { %202 = vlog2.f32 %v155_v44 }
  0xbd   :  { %v203_v46 = vpop.eup %202 }
  0xbe   :  { %v157_v48 = vmul.f32 0.6931472, %v203_v46 }
  0xc0   :  { %v158_v49 = vadd.f32 %v157_v48, %v150_v47 }
  0xc2   :  { %v159_v50 = vsub.f32 0.0, %v158_v49 }
  0xc4   :  { %v160_v51 = vsub.f32 %v159_v50, %v148_v39 }
  0xc6   :  { %v161_v52 = vsel %vm365_vm0, %v159_v50, %v160_v51 }
  0xc7   :  { %162 = vst [vmem:[#allocation13] sm:$0xff] %v161_v52 }
  0xc8   :  { %173 = dma.vmem_to_hbm [thread:$0]  %s169_s24, 128, %s171_s27, [#allocation4]  }
  0xc9   :  { %310 = dma.done.wait [#allocation4], 128  }
  0xca   :  { %311 = vsyncadd [#allocation4], 4294967168 }
  0xcb   :  { %178 = vsyncpa [#allocation3], 1 }
  0xcc   :  { %179 = vsyncpa [#allocation4], 1 }
  0xcd   :  { %180 = vsyncpa [#allocation5], 1 }
  0xce   :  { %181 = vsyncpa [#allocation9], 1 }
  0xcf   :  { %182 = vsyncpa [#allocation6], 1 }
  0xd0   :  { %183 = vsyncpa [#allocation12], 1 }

</bundles_post_ra>
